<compile_context>
chip_gen: v5e
topology: v5e:2x2
jax: 0.10.0
libtpu: 0.0.40
codegen_flags: <defaults>
</compile_context>

<pallas_src>
import jax
import jax.numpy as jnp
from jax import lax
from jax.experimental import pallas as pl
from jax.experimental.pallas import tpu as pltpu

NEG_SLOPE = 0.3229  # x4 = where(x1 > 0, x1, x1 * 0.3229)


def _leaky(y):
    return jnp.where(y > 0.0, y, y * NEG_SLOPE)


def _tile_kernel(w_ref, x_ref, o_ref):
    # w_ref: (C_in, C_out) resident across the grid
    # x_ref: (C_in, ts)    one NCHW-native spatial tile (lanes = spatial)
    # o_ref: (C_out, ts)
    y = lax.dot_general(
        w_ref[...], x_ref[...],
        dimension_numbers=(((0,), (0,)), ((), ())),   # contract C_in; no transpose needed
        preferred_element_type=jnp.float32,
    )
    o_ref[...] = _leaky(y).astype(o_ref.dtype)


def _folded_kernel(w_ref, x_ref, o_ref):
    # Whole (tiny) problem in one grid step: x_ref (N, C_in, HW), o_ref (N, C_out, HW).
    # Static Python loop over N keeps each matmul a plain 2-D MXU dot.
    w = w_ref[...]
    for n in range(x_ref.shape[0]):
        y = lax.dot_general(
            w, x_ref[n],
            dimension_numbers=(((0,), (0,)), ((), ())),
            preferred_element_type=jnp.float32,
        )
        o_ref[n] = _leaky(y).astype(o_ref.dtype)


def conv_transpose_1x1_leaky(x_nchw, weight, *, ts=4096, compute_dtype=None):
    """x_nchw: (N, C_in, H, W); weight: (C_in, C_out, 1, 1) (ConvTranspose2d layout).

    ts: spatial lane tile (multiple of 128).
    compute_dtype: optional narrower dtype (e.g. jnp.bfloat16) for the HBM streams;
                   accumulation stays f32 and the output keeps x_nchw.dtype.
    """
    N, C_in, H, W = x_nchw.shape
    C_out = weight.shape[1]
    HW = H * W
    out_dtype = x_nchw.dtype
    assert ts % 128 == 0, "ts must be a multiple of 128"

    # Free reshapes (no data movement): spatial axis becomes the lane axis; weight stays
    # in its native (C_in, C_out) layout — the kernel contracts dim 0, no transpose emitted.
    x3 = x_nchw.reshape(N, C_in, HW)
    w2 = weight.reshape(C_in, C_out)
    if compute_dtype is not None:
        x3 = x3.astype(compute_dtype)
        w2 = w2.astype(compute_dtype)

    in_itemsize = jnp.dtype(x3.dtype).itemsize
    cost = pl.CostEstimate(
        flops=2 * N * HW * C_in * C_out,
        transcendentals=0,
        bytes_accessed=(N * C_in * HW + C_in * C_out) * in_itemsize
        + N * C_out * HW * jnp.dtype(out_dtype).itemsize,
    )

    # --- Tiny-problem path: collapse the grid to a single step (v5e/v6e overhead win). ---
    if N * HW <= 2048 and HW <= ts:
        out3 = pl.pallas_call(
            _folded_kernel,
            out_shape=jax.ShapeDtypeStruct((N, C_out, HW), out_dtype),
            grid_spec=pltpu.PrefetchScalarGridSpec(
                num_scalar_prefetch=0,
                grid=(1,),
                in_specs=[
                    pl.BlockSpec((C_in, C_out), lambda s: (0, 0)),
                    pl.BlockSpec((N, C_in, HW), lambda s: (0, 0, 0)),
                ],
                out_specs=pl.BlockSpec((N, C_out, HW), lambda s: (0, 0, 0)),
            ),
            compiler_params=pltpu.CompilerParams(
                dimension_semantics=("arbitrary",),
            ),
            cost_estimate=cost,
        )(w2, x3)
        return out3.reshape(N, C_out, H, W)

    # --- Tiled path: grid = (N, n_spatial), both axes parallel (megacore-friendly). ---
    if HW <= ts:
        if N == 1 and HW >= 256:
            # N==1: split the spatial axis into >=2 blocks so v7x's 2 TCs both get work.
            ts_eff = ((pl.cdiv(HW, 2) + 127) // 128) * 128
        else:
            ts_eff = HW          # full-extent last dim (exempt from 128-divisibility)
    else:
        ts_eff = ts              # lane tile, multiple of 128
    n_spatial = pl.cdiv(HW, ts_eff)   # ragged trailing block -> masked stores, no pad/slice

    out3 = pl.pallas_call(
        _tile_kernel,
        out_shape=jax.ShapeDtypeStruct((N, C_out, HW), out_dtype),
        grid_spec=pltpu.PrefetchScalarGridSpec(
            num_scalar_prefetch=0,
            grid=(N, n_spatial),
            in_specs=[
                pl.BlockSpec((C_in, C_out), lambda n, s: (0, 0)),            # weight, resident
                pl.BlockSpec((None, C_in, ts_eff), lambda n, s: (n, 0, s)),  # x tile
            ],
            out_specs=pl.BlockSpec((None, C_out, ts_eff), lambda n, s: (n, 0, s)),
        ),
        compiler_params=pltpu.CompilerParams(
            dimension_semantics=("parallel", "parallel"),
        ),
        cost_estimate=cost,
    )(w2, x3)
    return out3.reshape(N, C_out, H, W)


if __name__ == "__main__":
    key = jax.random.PRNGKey(0)
    k_x, k_w = jax.random.split(key)

    # Shapes from the module spec: x = torch.randn(1, 128, 13, 13); channels fixed at 128.
    N, C, H, W = 1, 128, 13, 13
    x = jax.random.normal(k_x, (N, C, H, W), dtype=jnp.float32)
    # ConvTranspose2d(128, 128, 1, bias=False) weight layout: (in, out, 1, 1)
    weight = jax.random.normal(k_w, (C, C, 1, 1), dtype=jnp.float32) * (1.0 / jnp.sqrt(C))

    def ref_fn(xx, ww):
        r = jnp.einsum("nihw,io->nohw", xx, ww.reshape(C, C))
        return jnp.where(r > 0, r, r * NEG_SLOPE)

    # 1) Spec shape -> folded single-grid-step path (f32, exact).
    out = conv_transpose_1x1_leaky(x, weight)
    jax.block_until_ready(out)
    ref = ref_fn(x, weight)
    assert out.shape == ref.shape
    assert jnp.allclose(out, ref, atol=1e-4, rtol=1e-4)

    # 2) Larger spatial, N=1 -> tiled path with >=2 parallel spatial blocks + ragged tail.
    x_big = jax.random.normal(k_x, (1, C, 70, 70), dtype=jnp.float32)   # HW=4900 > ts=4096
    out_big = conv_transpose_1x1_leaky(x_big, weight)
    jax.block_until_ready(out_big)
    assert jnp.allclose(out_big, ref_fn(x_big, weight), atol=1e-4, rtol=1e-4)

    # 3) N>=2 with a full-extent spatial block per batch element.
    x_b2 = jax.random.normal(k_x, (2, C, 48, 48), dtype=jnp.float32)
    out_b2 = conv_transpose_1x1_leaky(x_b2, weight)
    jax.block_until_ready(out_b2)
    assert jnp.allclose(out_b2, ref_fn(x_b2, weight), atol=1e-4, rtol=1e-4)

    # 4) Optional bf16 input path (halves HBM traffic); accumulation stays f32, loose tolerance.
    out_bf16 = conv_transpose_1x1_leaky(x_big, weight, compute_dtype=jnp.bfloat16)
    jax.block_until_ready(out_bf16)
    assert jnp.allclose(out_bf16, ref_fn(x_big, weight), atol=5e-2, rtol=5e-2)

    print("KERNEL_OK")
</pallas_src>

<mosaic_0001>
module attributes {stable_mosaic.version = 11 : i64} {
  func.func @_folded_kernel(%arg0: i32, %arg1: memref<128x128xf32, #tpu.memory_space<vmem>>, %arg2: memref<1x128x169xf32, #tpu.memory_space<vmem>>, %arg3: memref<1x128x169xf32, #tpu.memory_space<vmem>>) attributes {dimension_semantics = [#tpu.dimension_semantics<arbitrary>], iteration_bounds = array<i64: 1>, scalar_prefetch = 0 : i64, scratch_operands = 0 : i64, tpu.core_type = #tpu.core_type<tc>, window_params = [{pipeline_mode = #tpu.pipeline_mode<synchronous>, transform_indices = @transform_0, window_bounds = array<i64: 128, 128>}, {pipeline_mode = #tpu.pipeline_mode<synchronous>, transform_indices = @transform_1, window_bounds = array<i64: 1, 128, 169>}, {pipeline_mode = #tpu.pipeline_mode<synchronous>, transform_indices = @transform_2, window_bounds = array<i64: 1, 128, 169>}]} {
    %c0 = arith.constant 0 : index
    %c0_0 = arith.constant 0 : index
    %0 = vector.load %arg1[%c0, %c0_0] : memref<128x128xf32, #tpu.memory_space<vmem>>, vector<128x128xf32>
    %c0_1 = arith.constant 0 : index
    %c0_2 = arith.constant 0 : index
    %c0_3 = arith.constant 0 : index
    %1 = vector.load %arg2[%c0_1, %c0_2, %c0_3] : memref<1x128x169xf32, #tpu.memory_space<vmem>>, vector<1x128x169xf32>
    %2 = vector.shape_cast %1 : vector<1x128x169xf32> to vector<128x169xf32>
    %cst = arith.constant dense<0.000000e+00> : vector<128x169xf32>
    %3 = tpu.matmul %0, %2, %cst {dimension_numbers = #tpu.dot_dimension_numbers<[0], [0], [1], [1], [0, 1, 1, 1], [], []>} : vector<128x128xf32>, vector<128x169xf32>, vector<128x169xf32> -> vector<128x169xf32>
    %cst_4 = arith.constant 0.000000e+00 : f32
    %4 = vector.broadcast %cst_4 : f32 to vector<128x169xf32>
    %5 = arith.cmpf ogt, %3, %4 : vector<128x169xf32>
    %cst_5 = arith.constant 3.229000e-01 : f32
    %6 = vector.broadcast %cst_5 : f32 to vector<128x169xf32>
    %7 = arith.mulf %3, %6 : vector<128x169xf32>
    %8 = arith.select %5, %3, %7 : vector<128x169xi1>, vector<128x169xf32>
    %c0_6 = arith.constant 0 : index
    %c0_7 = arith.constant 0 : index
    %c0_8 = arith.constant 0 : index
    %9 = vector.load %arg3[%c0_6, %c0_7, %c0_8] : memref<1x128x169xf32, #tpu.memory_space<vmem>>, vector<1x128x169xf32>
    %10 = vector.shape_cast %9 : vector<1x128x169xf32> to vector<128x169xf32>
    %11 = vector.shape_cast %8 : vector<128x169xf32> to vector<1x128x169xf32>
    tpu.vector_store %arg3[%c0_6, %c0_7, %c0_8], %11 {strides = array<i32>} : memref<1x128x169xf32, #tpu.memory_space<vmem>>, vector<1x128x169xf32>,
    return
  }
  func.func @transform_0(%arg0: i32) -> (i32, i32) {
    %c0_i32 = arith.constant 0 : i32
    %c0_i32_0 = arith.constant 0 : i32
    %c0_i32_1 = arith.constant 0 : i32
    return %c0_i32, %c0_i32_0 : i32, i32
  }
  func.func @transform_1(%arg0: i32) -> (i32, i32, i32) {
    %c0_i32 = arith.constant 0 : i32
    %c0_i32_0 = arith.constant 0 : i32
    %c0_i32_1 = arith.constant 0 : i32
    %c0_i32_2 = arith.constant 0 : i32
    return %c0_i32, %c0_i32_0, %c0_i32_1 : i32, i32, i32
  }
  func.func @transform_2(%arg0: i32) -> (i32, i32, i32) {
    %c0_i32 = arith.constant 0 : i32
    %c0_i32_0 = arith.constant 0 : i32
    %c0_i32_1 = arith.constant 0 : i32
    %c0_i32_2 = arith.constant 0 : i32
    return %c0_i32, %c0_i32_0, %c0_i32_1 : i32, i32, i32
  }
}

</mosaic_0001>

<bundles_post_ra>
// kernel: tpu_custom_call.1
= control target key start
LH: loop header
LB: loop body
LE: loop exit
PB: predicated region body
PF: predicated region fallthrough
CT: control target
= control target key end

     0   :  { %vm318_vm2 = vcmask 334848   ;;  %s657_s0 = inlined_call_operand.vmem [shape: f32[128,128], index: 0, kind: input, shape index: {}]   ;;  %s658_s1 = inlined_call_operand.vmem [shape: f32[1,128,169], index: 1, kind: input, shape index: {}]   ;;  %s659_s2 = inlined_call_operand.vmem [shape: f32[1,128,169], index: 2, kind: output, shape index: {}]  }
   0x1   :  { %v11_v0 = vld [vmem:[%s657_s0] sm:$0xff]  ;;  %v12_v1 = vld [vmem:[%s657_s0 + $0x8] sm:$0xff]  ;;  %v13_v2 = vld [vmem:[%s657_s0 + $0x10] sm:$0xff] }
   0x2   :  { %59 = vxpose.xlu0.b32.start [1/16] %v11_v0, 128  ;;  %v14_v3 = vld [vmem:[%s657_s0 + $0x18] sm:$0xff]  ;;  %v15_v4 = vld [vmem:[%s657_s0 + $0x20] sm:$0xff]  ;;  %v16_v5 = vld [vmem:[%s657_s0 + $0x28] sm:$0xff] }
   0x3   :  { %v17_v6 = vld [vmem:[%s657_s0 + $0x30] sm:$0xff]  ;;  %v18_v7 = vld [vmem:[%s657_s0 + $0x38] sm:$0xff]  ;;  %v19_v8 = vld [vmem:[%s657_s0 + $0x40] sm:$0xff] }
   0x4   :  { %v20_v9 = vld [vmem:[%s657_s0 + $0x48] sm:$0xff]  ;;  %v21_v10 = vld [vmem:[%s657_s0 + $0x50] sm:$0xff]  ;;  %v22_v11 = vld [vmem:[%s657_s0 + $0x58] sm:$0xff] }
   0x5   :  { %v57_v12 = vld [vmem:[%s658_s1 + $0xf0] sm:$0xff]  ;;  %v58_v13 = vld [vmem:[%s658_s1 + $0xf8] sm:$0xff]  ;;  %v55_v14 = vld [vmem:[%s658_s1 + $0xe0] sm:$0xff] }
   0x6   :  { %91 = vmatpush.msra.mxu0 %v57_v12  ;;  %156 = vmatpush.msra.mxu1 %v58_v13  ;;  %v56_v15 = vld [vmem:[%s658_s1 + $0xe8] sm:$0xff]  ;;  %v53_v16 = vld [vmem:[%s658_s1 + $0xd0] sm:$0xff]  ;;  %v54_v17 = vld [vmem:[%s658_s1 + $0xd8] sm:$0xff] }
   0x7   :  { %354 = vmatpush.msra.mxu2 %v57_v12  ;;  %370 = vmatpush.msra.mxu3 %v58_v13  ;;  %v51_v18 = vld [vmem:[%s658_s1 + $0xc0] sm:$0xff]  ;;  %v52_v19 = vld [vmem:[%s658_s1 + $0xc8] sm:$0xff]  ;;  %v49_v21 = vld [vmem:[%s658_s1 + $0xb0] sm:$0xff] }
   0x8   :  { %92 = vmatpush.msra.mxu0 %v55_v14  ;;  %157 = vmatpush.msra.mxu1 %v56_v15  ;;  %v23_v20 = vld [vmem:[%s657_s0 + $0x60] sm:$0xff]  ;;  %v50_v22 = vld [vmem:[%s658_s1 + $0xb8] sm:$0xff]  ;;  %v48_v24 = vld [vmem:[%s658_s1 + $0xa8] sm:$0xff] }
   0x9   :  { %355 = vmatpush.msra.mxu2 %v55_v14  ;;  %371 = vmatpush.msra.mxu3 %v56_v15  ;;  %v47_v23 = vld [vmem:[%s658_s1 + $0xa0] sm:$0xff]  ;;  %v45_v25 = vld [vmem:[%s658_s1 + $0x90] sm:$0xff]  ;;  %v46_v26 = vld [vmem:[%s658_s1 + $0x98] sm:$0xff] }
   0xa   :  { %60 = vxpose.xlu0.b32.cont [2/16] %v12_v1, 128  ;;  %93 = vmatpush.msra.mxu0 %v53_v16  ;;  %v43_v27 = vld [vmem:[%s658_s1 + $0x80] sm:$0xff]  ;;  %v44_v28 = vld [vmem:[%s658_s1 + $0x88] sm:$0xff]  ;;  %v41_v30 = vld [vmem:[%s658_s1 + $0x70] sm:$0xff] }
   0xb   :  { %158 = vmatpush.msra.mxu1 %v54_v17  ;;  %356 = vmatpush.msra.mxu2 %v53_v16  ;;  %v24_v29 = vld [vmem:[%s657_s0 + $0x68] sm:$0xff]  ;;  %v42_v31 = vld [vmem:[%s658_s1 + $0x78] sm:$0xff]  ;;  %v39_v32 = vld [vmem:[%s658_s1 + $0x60] sm:$0xff] }
   0xc   :  { %372 = vmatpush.msra.mxu3 %v54_v17  ;;  %94 = vmatpush.msra.mxu0 %v51_v18  ;;  %v40_v33 = vld [vmem:[%s658_s1 + $0x68] sm:$0xff]  ;;  %v37_v34 = vld [vmem:[%s658_s1 + $0x50] sm:$0xff]  ;;  %v38_v35 = vld [vmem:[%s658_s1 + $0x58] sm:$0xff] }
   0xd   :  { %159 = vmatpush.msra.mxu1 %v52_v19  ;;  %357 = vmatpush.msra.mxu2 %v51_v18  ;;  %v35_v36 = vld [vmem:[%s658_s1 + $0x40] sm:$0xff]  ;;  %v36_v37 = vld [vmem:[%s658_s1 + $0x48] sm:$0xff]  ;;  %v25_v38 = vld [vmem:[%s657_s0 + $0x70] sm:$0xff] }
   0xe   :  { %95 = vmatpush.msra.mxu0 %v49_v21  ;;  %373 = vmatpush.msra.mxu3 %v52_v19  ;;  %v33_v39 = vld [vmem:[%s658_s1 + $0x30] sm:$0xff]  ;;  %v34_v40 = vld [vmem:[%s658_s1 + $0x38] sm:$0xff]  ;;  %v31_v41 = vld [vmem:[%s658_s1 + $0x20] sm:$0xff] }
   0xf   :  { %160 = vmatpush.msra.mxu1 %v50_v22  ;;  %358 = vmatpush.msra.mxu2 %v49_v21  ;;  %v32_v42 = vld [vmem:[%s658_s1 + $0x28] sm:$0xff]  ;;  %v29_v43 = vld [vmem:[%s658_s1 + $0x10] sm:$0xff]  ;;  %v30_v44 = vld [vmem:[%s658_s1 + $0x18] sm:$0xff] }
  0x10   :  { %96 = vmatpush.msra.mxu0 %v47_v23  ;;  %374 = vmatpush.msra.mxu3 %v50_v22  ;;  %v26_v45 = vld [vmem:[%s657_s0 + $0x78] sm:$0xff]  ;;  %v27_v46 = vld [vmem:[%s658_s1] sm:$0xff]  ;;  %v28_v47 = vld [vmem:[%s658_s1 + $0x8] sm:$0xff] }
  0x11   :  { %161 = vmatpush.msra.mxu1 %v48_v24  ;;  %359 = vmatpush.msra.mxu2 %v47_v23 }
  0x12   :  { %61 = vxpose.xlu0.b32.cont [3/16] %v13_v2, 128  ;;  %97 = vmatpush.msra.mxu0 %v45_v25 }
  0x13   :  { %162 = vmatpush.msra.mxu1 %v46_v26  ;;  %375 = vmatpush.msra.mxu3 %v48_v24 }
  0x14   :  { %360 = vmatpush.msra.mxu2 %v45_v25  ;;  %98 = vmatpush.msra.mxu0 %v43_v27 }
  0x15   :  { %163 = vmatpush.msra.mxu1 %v44_v28  ;;  %376 = vmatpush.msra.mxu3 %v46_v26 }
  0x16   :  { %99 = vmatpush.msra.mxu0 %v41_v30  ;;  %361 = vmatpush.msra.mxu2 %v43_v27 }
  0x17   :  { %164 = vmatpush.msra.mxu1 %v42_v31  ;;  %377 = vmatpush.msra.mxu3 %v44_v28 }
  0x18   :  { %100 = vmatpush.msra.mxu0 %v39_v32  ;;  %362 = vmatpush.msra.mxu2 %v41_v30 }
  0x19   :  { %165 = vmatpush.msra.mxu1 %v40_v33  ;;  %378 = vmatpush.msra.mxu3 %v42_v31 }
  0x1a   :  { %62 = vxpose.xlu0.b32.cont [4/16] %v14_v3, 128  ;;  %101 = vmatpush.msra.mxu0 %v37_v34 }
  0x1b   :  { %166 = vmatpush.msra.mxu1 %v38_v35  ;;  %363 = vmatpush.msra.mxu2 %v39_v32 }
  0x1c   :  { %379 = vmatpush.msra.mxu3 %v40_v33  ;;  %102 = vmatpush.msra.mxu0 %v35_v36 }
  0x1d   :  { %167 = vmatpush.msra.mxu1 %v36_v37  ;;  %364 = vmatpush.msra.mxu2 %v37_v34 }
  0x1e   :  { %103 = vmatpush.msra.mxu0 %v33_v39  ;;  %380 = vmatpush.msra.mxu3 %v38_v35 }
  0x1f   :  { %168 = vmatpush.msra.mxu1 %v34_v40  ;;  %365 = vmatpush.msra.mxu2 %v35_v36 }
  0x20   :  { %104 = vmatpush.msra.mxu0 %v31_v41  ;;  %381 = vmatpush.msra.mxu3 %v36_v37 }
  0x21   :  { %169 = vmatpush.msra.mxu1 %v32_v42  ;;  %366 = vmatpush.msra.mxu2 %v33_v39 }
  0x22   :  { %63 = vxpose.xlu0.b32.cont [5/16] %v15_v4, 128  ;;  %105 = vmatpush.msra.mxu0 %v29_v43 }
  0x23   :  { %170 = vmatpush.msra.mxu1 %v30_v44  ;;  %382 = vmatpush.msra.mxu3 %v34_v40 }
  0x24   :  { %367 = vmatpush.msra.mxu2 %v31_v41  ;;  %106 = vmatpush.msra.mxu0 %v27_v46 }
  0x25   :  { %383 = vmatpush.msra.mxu3 %v32_v42  ;;  %171 = vmatpush.msra.mxu1 %v28_v47 }
  0x26   :  { %368 = vmatpush.msra.mxu2 %v29_v43 }
  0x27   :  { %384 = vmatpush.msra.mxu3 %v30_v44 }
  0x28   :  { %369 = vmatpush.msra.mxu2 %v27_v46 }
  0x29   :  { %385 = vmatpush.msra.mxu3 %v28_v47 }
  0x2a   :  { %64 = vxpose.xlu0.b32.cont [6/16] %v16_v5, 128 }
  0x32   :  { %65 = vxpose.xlu0.b32.cont [7/16] %v17_v6, 128 }
  0x3a   :  { %66 = vxpose.xlu0.b32.cont [8/16] %v18_v7, 128 }
  0x42   :  { %67 = vxpose.xlu0.b32.cont [9/16] %v19_v8, 128 }
  0x4a   :  { %68 = vxpose.xlu0.b32.cont [10/16] %v20_v9, 128 }
  0x52   :  { %69 = vxpose.xlu0.b32.cont [11/16] %v21_v10, 128 }
  0x5a   :  { %70 = vxpose.xlu0.b32.cont [12/16] %v22_v11, 128 }
  0x62   :  { %71 = vxpose.xlu0.b32.cont [13/16] %v23_v20, 128 }
  0x6a   :  { %72 = vxpose.xlu0.b32.cont [14/16] %v24_v29, 128 }
  0x72   :  { %73 = vxpose.xlu0.b32.cont [15/16] %v25_v38, 128 }
  0x7a   :  { %74 = vxpose.xlu0.b32.end [16/16] %v26_v45, 128 }
  0xa6   :  { %v75_v48 = vpop.trf.xlu0 }
  0xa7   :  { %107 = vmatmul.f32.vlgmr.msra.gmra.mxu0 %v75_v48  ;;  %172 = vmatmul.f32.vlgmr.msra.gmra.mxu1 %v75_v48 }
  0xae   :  { %v76_v49 = vpop.trf.xlu0 }
  0xaf   :  { %110 = vmatmul.f32.gmra.mxu0 %v76_v49  ;;  %175 = vmatmul.f32.gmra.mxu1 %v76_v49 }
  0xb6   :  { %v77_v50 = vpop.trf.xlu0 }
  0xb7   :  { %113 = vmatmul.f32.gmra.mxu0 %v77_v50  ;;  %178 = vmatmul.f32.gmra.mxu1 %v77_v50 }
  0xbe   :  { %v78_v51 = vpop.trf.xlu0 }
  0xbf   :  { %116 = vmatmul.f32.gmra.mxu0 %v78_v51  ;;  %181 = vmatmul.f32.gmra.mxu1 %v78_v51 }
  0xc6   :  { %v79_v52 = vpop.trf.xlu0 }
  0xc7   :  { %119 = vmatmul.f32.gmra.mxu0 %v79_v52  ;;  %184 = vmatmul.f32.gmra.mxu1 %v79_v52 }
  0xce   :  { %v80_v53 = vpop.trf.xlu0 }
  0xcf   :  { %122 = vmatmul.f32.gmra.mxu0 %v80_v53  ;;  %187 = vmatmul.f32.gmra.mxu1 %v80_v53 }
  0xd6   :  { %v81_v54 = vpop.trf.xlu0 }
  0xd7   :  { %125 = vmatmul.f32.gmra.mxu0 %v81_v54  ;;  %190 = vmatmul.f32.gmra.mxu1 %v81_v54 }
  0xde   :  { %v82_v55 = vpop.trf.xlu0 }
  0xdf   :  { %128 = vmatmul.f32.gmra.mxu0 %v82_v55  ;;  %193 = vmatmul.f32.gmra.mxu1 %v82_v55 }
  0xe6   :  { %v83_v56 = vpop.trf.xlu0 }
  0xe7   :  { %131 = vmatmul.f32.vlgmr.msra.gmra.mxu2 %v83_v56  ;;  %196 = vmatmul.f32.vlgmr.msra.gmra.mxu3 %v83_v56 }
  0xee   :  { %v84_v57 = vpop.trf.xlu0 }
  0xef   :  { %134 = vmatmul.f32.gmra.mxu2 %v84_v57  ;;  %199 = vmatmul.f32.gmra.mxu3 %v84_v57 }
  0xf6   :  { %v85_v58 = vpop.trf.xlu0 }
  0xf7   :  { %137 = vmatmul.f32.gmra.mxu2 %v85_v58  ;;  %202 = vmatmul.f32.gmra.mxu3 %v85_v58 }
  0xfe   :  { %v86_v59 = vpop.trf.xlu0 }
  0xff   :  { %140 = vmatmul.f32.gmra.mxu2 %v86_v59  ;;  %205 = vmatmul.f32.gmra.mxu3 %v86_v59 }
 0x106   :  { %v87_v60 = vpop.trf.xlu0 }
 0x107   :  { %143 = vmatmul.f32.gmra.mxu2 %v87_v60  ;;  %208 = vmatmul.f32.gmra.mxu3 %v87_v60 }
 0x10e   :  { %v88_v61 = vpop.trf.xlu0 }
 0x10f   :  { %146 = vmatmul.f32.gmra.mxu2 %v88_v61  ;;  %211 = vmatmul.f32.gmra.mxu3 %v88_v61 }
 0x116   :  { %v89_v62 = vpop.trf.xlu0 }
 0x117   :  { %149 = vmatmul.f32.gmra.mxu2 %v89_v62  ;;  %214 = vmatmul.f32.gmra.mxu3 %v89_v62 }
 0x11e   :  { %v90_v63 = vpop.trf.xlu0 }
 0x11f   :  { %152 = vmatmul.f32.gmra.mxu2 %v90_v63  ;;  %217 = vmatmul.f32.gmra.mxu3 %v90_v63 }
 0x124   :  { %v108_v0 = vpop.f32.mrf.mxu0  ;;  %v173_v1 = vpop.f32.mrf.mxu1 }
 0x125   :  { %vm221_vm0 = vcmp.gt.f32.partialorder %v108_v0, 0.0  ;;  %v253_v2 = vmul.f32 0.3229, %v108_v0  ;;  %vm222_vm1 = vcmp.gt.f32.partialorder %v173_v1, 0.0  ;;  %v254_v3 = vmul.f32 0.3229, %v173_v1 }
 0x127   :  { %v285_v4 = vsel %vm221_vm0, %v108_v0, %v253_v2  ;;  %v286_v5 = vsel %vm222_vm1, %v173_v1, %v254_v3 }
 0x128   :  { %317 = vst [vmem:[%s659_s2] sm:$0xff] %v285_v4 }
 0x129   :  { %319 = vst.msk [vmem:[%s659_s2 + $0x8] sm:$0xff] %vm318_vm2, %v286_v5 }
 0x12c   :  { %v111_v6 = vpop.f32.mrf.mxu0  ;;  %v176_v7 = vpop.f32.mrf.mxu1 }
 0x12d   :  { %vm223_vm3 = vcmp.gt.f32.partialorder %v111_v6, 0.0  ;;  %v255_v8 = vmul.f32 0.3229, %v111_v6  ;;  %vm224_vm4 = vcmp.gt.f32.partialorder %v176_v7, 0.0  ;;  %v256_v9 = vmul.f32 0.3229, %v176_v7 }
 0x12f   :  { %v287_v10 = vsel %vm223_vm3, %v111_v6, %v255_v8  ;;  %v288_v11 = vsel %vm224_vm4, %v176_v7, %v256_v9 }
 0x130   :  { %320 = vst [vmem:[%s659_s2 + $0x10] sm:$0xff] %v287_v10 }
 0x131   :  { %321 = vst.msk [vmem:[%s659_s2 + $0x18] sm:$0xff] %vm318_vm2, %v288_v11 }
 0x134   :  { %v114_v12 = vpop.f32.mrf.mxu0  ;;  %v179_v13 = vpop.f32.mrf.mxu1 }
 0x135   :  { %vm225_vm5 = vcmp.gt.f32.partialorder %v114_v12, 0.0  ;;  %v257_v14 = vmul.f32 0.3229, %v114_v12  ;;  %vm226_vm6 = vcmp.gt.f32.partialorder %v179_v13, 0.0  ;;  %v258_v15 = vmul.f32 0.3229, %v179_v13 }
 0x137   :  { %v289_v16 = vsel %vm225_vm5, %v114_v12, %v257_v14  ;;  %v290_v17 = vsel %vm226_vm6, %v179_v13, %v258_v15 }
 0x138   :  { %322 = vst [vmem:[%s659_s2 + $0x20] sm:$0xff] %v289_v16 }
 0x139   :  { %323 = vst.msk [vmem:[%s659_s2 + $0x28] sm:$0xff] %vm318_vm2, %v290_v17 }
 0x13c   :  { %v117_v18 = vpop.f32.mrf.mxu0  ;;  %v182_v19 = vpop.f32.mrf.mxu1 }
 0x13d   :  { %vm227_vm7 = vcmp.gt.f32.partialorder %v117_v18, 0.0  ;;  %v259_v20 = vmul.f32 0.3229, %v117_v18  ;;  %vm228_vm8 = vcmp.gt.f32.partialorder %v182_v19, 0.0  ;;  %v260_v21 = vmul.f32 0.3229, %v182_v19 }
 0x13f   :  { %v291_v22 = vsel %vm227_vm7, %v117_v18, %v259_v20  ;;  %v292_v23 = vsel %vm228_vm8, %v182_v19, %v260_v21 }
 0x140   :  { %324 = vst [vmem:[%s659_s2 + $0x30] sm:$0xff] %v291_v22 }
 0x141   :  { %325 = vst.msk [vmem:[%s659_s2 + $0x38] sm:$0xff] %vm318_vm2, %v292_v23 }
 0x144   :  { %v120_v24 = vpop.f32.mrf.mxu0  ;;  %v185_v25 = vpop.f32.mrf.mxu1 }
 0x145   :  { %vm229_vm9 = vcmp.gt.f32.partialorder %v120_v24, 0.0  ;;  %v261_v26 = vmul.f32 0.3229, %v120_v24  ;;  %vm230_vm10 = vcmp.gt.f32.partialorder %v185_v25, 0.0  ;;  %v262_v27 = vmul.f32 0.3229, %v185_v25 }
 0x147   :  { %v293_v28 = vsel %vm229_vm9, %v120_v24, %v261_v26  ;;  %v294_v29 = vsel %vm230_vm10, %v185_v25, %v262_v27 }
 0x148   :  { %326 = vst [vmem:[%s659_s2 + $0x40] sm:$0xff] %v293_v28 }
 0x149   :  { %327 = vst.msk [vmem:[%s659_s2 + $0x48] sm:$0xff] %vm318_vm2, %v294_v29 }
 0x14c   :  { %v123_v30 = vpop.f32.mrf.mxu0  ;;  %v188_v31 = vpop.f32.mrf.mxu1 }
 0x14d   :  { %vm231_vm11 = vcmp.gt.f32.partialorder %v123_v30, 0.0  ;;  %v263_v32 = vmul.f32 0.3229, %v123_v30  ;;  %vm232_vm12 = vcmp.gt.f32.partialorder %v188_v31, 0.0  ;;  %v264_v33 = vmul.f32 0.3229, %v188_v31 }
 0x14f   :  { %v295_v34 = vsel %vm231_vm11, %v123_v30, %v263_v32  ;;  %v296_v35 = vsel %vm232_vm12, %v188_v31, %v264_v33 }
 0x150   :  { %328 = vst [vmem:[%s659_s2 + $0x50] sm:$0xff] %v295_v34 }
 0x151   :  { %329 = vst.msk [vmem:[%s659_s2 + $0x58] sm:$0xff] %vm318_vm2, %v296_v35 }
 0x154   :  { %v126_v36 = vpop.f32.mrf.mxu0  ;;  %v191_v37 = vpop.f32.mrf.mxu1 }
 0x155   :  { %vm233_vm13 = vcmp.gt.f32.partialorder %v126_v36, 0.0  ;;  %v265_v38 = vmul.f32 0.3229, %v126_v36  ;;  %vm234_vm14 = vcmp.gt.f32.partialorder %v191_v37, 0.0  ;;  %v266_v39 = vmul.f32 0.3229, %v191_v37 }
 0x157   :  { %v297_v40 = vsel %vm233_vm13, %v126_v36, %v265_v38  ;;  %v298_v41 = vsel %vm234_vm14, %v191_v37, %v266_v39 }
 0x158   :  { %330 = vst [vmem:[%s659_s2 + $0x60] sm:$0xff] %v297_v40 }
 0x159   :  { %331 = vst.msk [vmem:[%s659_s2 + $0x68] sm:$0xff] %vm318_vm2, %v298_v41 }
 0x15c   :  { %v129_v42 = vpop.f32.mrf.mxu0  ;;  %v194_v43 = vpop.f32.mrf.mxu1 }
 0x15d   :  { %vm235_vm15 = vcmp.gt.f32.partialorder %v129_v42, 0.0  ;;  %v267_v44 = vmul.f32 0.3229, %v129_v42  ;;  %vm236_vm0 = vcmp.gt.f32.partialorder %v194_v43, 0.0  ;;  %v268_v45 = vmul.f32 0.3229, %v194_v43 }
 0x15f   :  { %v299_v46 = vsel %vm235_vm15, %v129_v42, %v267_v44  ;;  %v300_v47 = vsel %vm236_vm0, %v194_v43, %v268_v45 }
 0x160   :  { %332 = vst [vmem:[%s659_s2 + $0x70] sm:$0xff] %v299_v46 }
 0x161   :  { %333 = vst.msk [vmem:[%s659_s2 + $0x78] sm:$0xff] %vm318_vm2, %v300_v47 }
 0x16a   :  { %v132_v48 = vpop.f32.mrf.mxu2  ;;  %v197_v49 = vpop.f32.mrf.mxu3 }
 0x16b   :  { %vm237_vm1 = vcmp.gt.f32.partialorder %v132_v48, 0.0  ;;  %v269_v50 = vmul.f32 0.3229, %v132_v48  ;;  %vm238_vm3 = vcmp.gt.f32.partialorder %v197_v49, 0.0  ;;  %v270_v51 = vmul.f32 0.3229, %v197_v49 }
 0x16d   :  { %v301_v52 = vsel %vm237_vm1, %v132_v48, %v269_v50  ;;  %v302_v53 = vsel %vm238_vm3, %v197_v49, %v270_v51 }
 0x16e   :  { %334 = vst [vmem:[%s659_s2 + $0x80] sm:$0xff] %v301_v52 }
 0x16f   :  { %335 = vst.msk [vmem:[%s659_s2 + $0x88] sm:$0xff] %vm318_vm2, %v302_v53 }
 0x172   :  { %v135_v54 = vpop.f32.mrf.mxu2  ;;  %v200_v55 = vpop.f32.mrf.mxu3 }
 0x173   :  { %vm239_vm4 = vcmp.gt.f32.partialorder %v135_v54, 0.0  ;;  %v271_v56 = vmul.f32 0.3229, %v135_v54  ;;  %vm240_vm5 = vcmp.gt.f32.partialorder %v200_v55, 0.0  ;;  %v272_v57 = vmul.f32 0.3229, %v200_v55 }
 0x175   :  { %v303_v58 = vsel %vm239_vm4, %v135_v54, %v271_v56  ;;  %v304_v59 = vsel %vm240_vm5, %v200_v55, %v272_v57 }
 0x176   :  { %336 = vst [vmem:[%s659_s2 + $0x90] sm:$0xff] %v303_v58 }
 0x177   :  { %337 = vst.msk [vmem:[%s659_s2 + $0x98] sm:$0xff] %vm318_vm2, %v304_v59 }
 0x17a   :  { %v138_v60 = vpop.f32.mrf.mxu2  ;;  %v203_v61 = vpop.f32.mrf.mxu3 }
 0x17b   :  { %vm241_vm6 = vcmp.gt.f32.partialorder %v138_v60, 0.0  ;;  %v273_v62 = vmul.f32 0.3229, %v138_v60  ;;  %vm242_vm7 = vcmp.gt.f32.partialorder %v203_v61, 0.0  ;;  %v274_v63 = vmul.f32 0.3229, %v203_v61 }
 0x17d   :  { %v305_v0 = vsel %vm241_vm6, %v138_v60, %v273_v62  ;;  %v306_v1 = vsel %vm242_vm7, %v203_v61, %v274_v63 }
 0x17e   :  { %338 = vst [vmem:[%s659_s2 + $0xa0] sm:$0xff] %v305_v0 }
 0x17f   :  { %339 = vst.msk [vmem:[%s659_s2 + $0xa8] sm:$0xff] %vm318_vm2, %v306_v1 }
 0x182   :  { %v141_v2 = vpop.f32.mrf.mxu2  ;;  %v206_v3 = vpop.f32.mrf.mxu3 }
 0x183   :  { %vm243_vm8 = vcmp.gt.f32.partialorder %v141_v2, 0.0  ;;  %v275_v4 = vmul.f32 0.3229, %v141_v2  ;;  %vm244_vm9 = vcmp.gt.f32.partialorder %v206_v3, 0.0  ;;  %v276_v5 = vmul.f32 0.3229, %v206_v3 }
 0x185   :  { %v307_v6 = vsel %vm243_vm8, %v141_v2, %v275_v4  ;;  %v308_v7 = vsel %vm244_vm9, %v206_v3, %v276_v5 }
 0x186   :  { %340 = vst [vmem:[%s659_s2 + $0xb0] sm:$0xff] %v307_v6 }
 0x187   :  { %341 = vst.msk [vmem:[%s659_s2 + $0xb8] sm:$0xff] %vm318_vm2, %v308_v7 }
 0x18a   :  { %v144_v8 = vpop.f32.mrf.mxu2  ;;  %v209_v9 = vpop.f32.mrf.mxu3 }
 0x18b   :  { %vm245_vm10 = vcmp.gt.f32.partialorder %v144_v8, 0.0  ;;  %v277_v10 = vmul.f32 0.3229, %v144_v8  ;;  %vm246_vm11 = vcmp.gt.f32.partialorder %v209_v9, 0.0  ;;  %v278_v11 = vmul.f32 0.3229, %v209_v9 }
 0x18d   :  { %v309_v12 = vsel %vm245_vm10, %v144_v8, %v277_v10  ;;  %v310_v13 = vsel %vm246_vm11, %v209_v9, %v278_v11 }
 0x18e   :  { %342 = vst [vmem:[%s659_s2 + $0xc0] sm:$0xff] %v309_v12 }
 0x18f   :  { %343 = vst.msk [vmem:[%s659_s2 + $0xc8] sm:$0xff] %vm318_vm2, %v310_v13 }
 0x192   :  { %v147_v14 = vpop.f32.mrf.mxu2  ;;  %v212_v15 = vpop.f32.mrf.mxu3 }
 0x193   :  { %vm247_vm12 = vcmp.gt.f32.partialorder %v147_v14, 0.0  ;;  %v279_v16 = vmul.f32 0.3229, %v147_v14  ;;  %vm248_vm13 = vcmp.gt.f32.partialorder %v212_v15, 0.0  ;;  %v280_v17 = vmul.f32 0.3229, %v212_v15 }
 0x195   :  { %v311_v18 = vsel %vm247_vm12, %v147_v14, %v279_v16  ;;  %v312_v19 = vsel %vm248_vm13, %v212_v15, %v280_v17 }
 0x196   :  { %344 = vst [vmem:[%s659_s2 + $0xd0] sm:$0xff] %v311_v18 }
 0x197   :  { %345 = vst.msk [vmem:[%s659_s2 + $0xd8] sm:$0xff] %vm318_vm2, %v312_v19 }
 0x19a   :  { %v150_v20 = vpop.f32.mrf.mxu2  ;;  %v215_v21 = vpop.f32.mrf.mxu3 }
 0x19b   :  { %vm249_vm14 = vcmp.gt.f32.partialorder %v150_v20, 0.0  ;;  %v281_v22 = vmul.f32 0.3229, %v150_v20  ;;  %vm250_vm15 = vcmp.gt.f32.partialorder %v215_v21, 0.0  ;;  %v282_v23 = vmul.f32 0.3229, %v215_v21 }
 0x19d   :  { %v313_v24 = vsel %vm249_vm14, %v150_v20, %v281_v22  ;;  %v314_v25 = vsel %vm250_vm15, %v215_v21, %v282_v23 }
 0x19e   :  { %346 = vst [vmem:[%s659_s2 + $0xe0] sm:$0xff] %v313_v24 }
 0x19f   :  { %347 = vst.msk [vmem:[%s659_s2 + $0xe8] sm:$0xff] %vm318_vm2, %v314_v25 }
 0x1a2   :  { %v153_v26 = vpop.f32.mrf.mxu2  ;;  %v218_v27 = vpop.f32.mrf.mxu3 }
 0x1a3   :  { %vm251_vm0 = vcmp.gt.f32.partialorder %v153_v26, 0.0  ;;  %v283_v28 = vmul.f32 0.3229, %v153_v26  ;;  %vm252_vm1 = vcmp.gt.f32.partialorder %v218_v27, 0.0  ;;  %v284_v29 = vmul.f32 0.3229, %v218_v27 }
 0x1a5   :  { %v315_v30 = vsel %vm251_vm0, %v153_v26, %v283_v28  ;;  %v316_v31 = vsel %vm252_vm1, %v218_v27, %v284_v29 }
 0x1a6   :  { %348 = vst [vmem:[%s659_s2 + $0xf0] sm:$0xff] %v315_v30 }
 0x1a7   :  { %349 = vst.msk [vmem:[%s659_s2 + $0xf8] sm:$0xff] %vm318_vm2, %v316_v31 }

</bundles_post_ra>
